<compile_context>
chip_gen: v6e
topology: v6e:2x2x1
jax: 0.10.0
libtpu: 0.0.40
codegen_flags: <defaults>
</compile_context>

<pallas_src>
import functools
import math

import jax
import jax.numpy as jnp
from jax.experimental import pallas as pl
from jax.experimental.pallas import tpu as pltpu

LOG_SQRT_2PI = 0.5 * math.log(2.0 * math.pi)


def linear_bbb_kernel(x_ref, w_mu_ref, w_rho_ref, w_eps_ref,
                      b_mu_ref, b_rho_ref, b_eps_ref,
                      *out_refs, return_samples):
    if return_samples:
        y_ref, w_out_ref, b_out_ref, lp_ref, lq_ref = out_refs
    else:
        y_ref, lp_ref, lq_ref = out_refs
        w_out_ref = b_out_ref = None

    k = pl.program_id(1)            # in_features (reduction) axis — last, "arbitrary"
    nk = pl.num_programs(1)

    # Upcast narrow (bf16) parameter streams to f32 once in VMEM; math stays f32.
    w_mu = w_mu_ref[...].astype(jnp.float32)
    w_rho = w_rho_ref[...].astype(jnp.float32)
    w_eps = w_eps_ref[...].astype(jnp.float32)
    w = w_mu + jnp.exp(w_rho) * w_eps                     # reparameterized sample

    if return_samples:
        w_out_ref[...] = w.astype(w_out_ref.dtype)        # optional narrow writeback

    # Column-wise (lane-resident) partial reductions: sublane reduce only, no
    # cross-lane work, no SMEM scalar round-trips.  (w - mu)/sigma == eps exactly.
    lp_part = jnp.sum(w * w, axis=0, keepdims=True)                          # (1, tn)
    lq_part = jnp.sum(w_rho + 0.5 * (w_eps * w_eps), axis=0, keepdims=True)  # (1, tn)

    part = jnp.dot(x_ref[...].astype(jnp.float32), w,
                   preferred_element_type=jnp.float32)                       # (B, tn)

    @pl.when(k == 0)
    def _first():                   # write directly — no zero-init store + reload
        y_ref[...] = part
        lp_ref[...] = lp_part
        lq_ref[...] = lq_part

    @pl.when(k != 0)
    def _accumulate():
        y_ref[...] += part
        lp_ref[...] += lp_part
        lq_ref[...] += lq_part

    @pl.when(k == nk - 1)
    def _finalize():
        b_mu = b_mu_ref[...].astype(jnp.float32)
        b_rho = b_rho_ref[...].astype(jnp.float32)
        b_eps = b_eps_ref[...].astype(jnp.float32)
        b = b_mu + jnp.exp(b_rho) * b_eps
        if return_samples:
            b_out_ref[...] = b.astype(b_out_ref.dtype)
        y_ref[...] += b                                    # broadcast over batch rows
        lp_ref[...] += b * b
        lq_ref[...] += b_rho + 0.5 * (b_eps * b_eps)


def _pick_tile(dim, max_tile):
    """(tile, padded_dim): full-dim block for small dims, else 128-aligned tiling."""
    if dim <= max_tile:
        return dim, dim
    padded = ((dim + 127) // 128) * 128
    tile = (max_tile // 128) * 128
    while padded % tile:
        tile -= 128
    return tile, padded


def _plan_tiles(batch, in_f, out_f, param_bytes, x_bytes,
                return_samples, max_tile, vmem_budget_bytes):
    """Batch-aware VMEM budget: x/weights double-buffered + resident y/lp/lq blocks."""
    mt = max(128, (max_tile // 128) * 128)
    while True:
        tile_k, in_pad = _pick_tile(in_f, mt)
        tile_n, out_pad = _pick_tile(out_f, mt)
        vmem = (2 * batch * tile_k * x_bytes                 # x (double-buffered)
                + 6 * tile_k * tile_n * param_bytes          # w_mu/w_rho/w_eps x 2 bufs
                + 6 * tile_n * param_bytes                   # b_mu/b_rho/b_eps x 2 bufs
                + 2 * batch * tile_n * 4                     # y accumulator
                + 4 * tile_n * 4)                            # lp / lq column partials
        if return_samples:
            vmem += 2 * (tile_k + 1) * tile_n * param_bytes  # sampled w / b writeback
        if vmem <= vmem_budget_bytes or mt <= 128:
            return tile_k, tile_n, in_pad, out_pad
        mt -= 128


def _pad2(a, rows, cols):
    pr, pc = rows - a.shape[0], cols - a.shape[1]
    if pr or pc:
        a = jnp.pad(a, ((0, pr), (0, pc)))
    return a


@functools.partial(jax.jit,
                   static_argnames=("return_samples", "max_tile", "vmem_budget_bytes"))
def linear_bbb_forward(x, w_mu_t, w_rho_t, b_mu, b_rho, w_eps, b_eps, *,
                       return_samples=False, max_tile=512,
                       vmem_budget_bytes=28 * 1024 * 1024):
    """Fused Bayes-by-Backprop linear forward.

    x        [batch, in_features]          f32
    w_mu_t   [in_features, out_features]   pre-transposed vs torch's [out, in]; f32/bf16
    w_rho_t  [in_features, out_features]
    b_mu     [out_features]
    b_rho    [out_features]
    w_eps    [in_features, out_features]   N(0,1) sample
    b_eps    [out_features]                N(0,1) sample

    Returns (y, log_prior, log_post[, w_sampled, b_sampled]).
    """
    batch, in_f = x.shape
    kdim, out_f = w_mu_t.shape
    assert kdim == in_f and w_rho_t.shape == w_mu_t.shape and w_eps.shape == w_mu_t.shape

    param_bytes = jnp.dtype(w_mu_t.dtype).itemsize
    x_bytes = jnp.dtype(x.dtype).itemsize
    tile_k, tile_n, in_pad, out_pad = _plan_tiles(
        batch, in_f, out_f, param_bytes, x_bytes, return_samples, max_tile,
        vmem_budget_bytes)
    nj, nk = out_pad // tile_n, in_pad // tile_k

    # Zero padding contributes exactly 0 to the matmul and to both log terms
    # (mu = rho = eps = 0 -> w = 0 and rho + 0.5*eps^2 = 0); constants use true counts.
    x_p = _pad2(x, batch, in_pad)
    w_mu_p = _pad2(w_mu_t, in_pad, out_pad)
    w_rho_p = _pad2(w_rho_t, in_pad, out_pad)
    w_eps_p = _pad2(w_eps, in_pad, out_pad)
    b_mu_p = _pad2(b_mu.reshape(1, out_f), 1, out_pad)
    b_rho_p = _pad2(b_rho.reshape(1, out_f), 1, out_pad)
    b_eps_p = _pad2(b_eps.reshape(1, out_f), 1, out_pad)

    w_spec = pl.BlockSpec((tile_k, tile_n), lambda j, k: (k, j))
    b_spec = pl.BlockSpec((1, tile_n), lambda j, k: (0, j))
    y_spec = pl.BlockSpec((batch, tile_n), lambda j, k: (0, j))
    col_spec = pl.BlockSpec((1, tile_n), lambda j, k: (0, j))

    out_shapes = [jax.ShapeDtypeStruct((batch, out_pad), jnp.float32)]
    out_specs = [y_spec]
    if return_samples:
        out_shapes += [jax.ShapeDtypeStruct((in_pad, out_pad), w_mu_t.dtype),
                       jax.ShapeDtypeStruct((1, out_pad), w_mu_t.dtype)]
        out_specs += [w_spec, b_spec]
    out_shapes += [jax.ShapeDtypeStruct((1, out_pad), jnp.float32),
                   jax.ShapeDtypeStruct((1, out_pad), jnp.float32)]
    out_specs += [col_spec, col_spec]

    # Advisory cost: HBM-streaming bound on the three weight-shaped read streams.
    w_read_bytes = 3 * in_pad * out_pad * param_bytes
    cost = pl.CostEstimate(
        flops=2 * batch * in_pad * out_pad + 8 * in_pad * out_pad,
        transcendentals=in_pad * out_pad + out_pad,
        bytes_accessed=int(nj * batch * in_pad * x_bytes + w_read_bytes
                           + batch * out_pad * 4 + 2 * out_pad * 4
                           + (in_pad * out_pad * param_bytes if return_samples else 0)),
    )

    kernel = functools.partial(linear_bbb_kernel, return_samples=return_samples)

    outs = pl.pallas_call(
        kernel,
        out_shape=tuple(out_shapes),
        grid_spec=pltpu.PrefetchScalarGridSpec(
            num_scalar_prefetch=0,
            grid=(nj, nk),                                    # reduction axis last
            in_specs=[
                pl.BlockSpec((batch, tile_k), lambda j, k: (0, k)),   # x
                w_spec, w_spec, w_spec,                               # w_mu, w_rho, w_eps
                b_spec, b_spec, b_spec,                               # b_mu, b_rho, b_eps
            ],
            out_specs=tuple(out_specs),
        ),
        compiler_params=pltpu.CompilerParams(
            # out_features tiles independent -> "parallel"; in_features reduction stays
            # "arbitrary" and last.  TODO(synk): raise vmem_budget_bytes / max_tile (and
            # vmem_limit_bytes) on v5e/v6e's 128 MiB VMEM for fewer grid steps.
            dimension_semantics=("parallel", "arbitrary"),
        ),
        cost_estimate=cost,
    )(x_p, w_mu_p, w_rho_p, w_eps_p, b_mu_p, b_rho_p, b_eps_p)

    if return_samples:
        y_p, w_s_p, b_s_p, lp_cols, lq_cols = outs
    else:
        y_p, lp_cols, lq_cols = outs
        w_s_p = b_s_p = None

    n_elems = (in_f + 1) * out_f                        # true (unpadded) element count
    log_prior = -n_elems * LOG_SQRT_2PI - 0.5 * jnp.sum(lp_cols)
    log_post = -n_elems * LOG_SQRT_2PI - jnp.sum(lq_cols)

    y = y_p[:, :out_f]
    if return_samples:
        return y, log_prior, log_post, w_s_p[:in_f, :out_f], b_s_p[0, :out_f]
    return y, log_prior, log_post


if __name__ == "__main__":
    # Module shapes: Linear_BBB(input_features=32, output_features=16), batch=8.
    in_features, out_features, batch = 32, 16, 8
    param_dtype = jnp.bfloat16        # halved HBM bytes for the mu / rho / eps streams

    root = jax.random.PRNGKey(0)
    k_x, k_wmu, k_wrho, k_bmu, k_brho, k_weps, k_beps = jax.random.split(root, 7)

    # Parameters mirror torch's __init__ distributions, stored pre-transposed
    # [in_features, out_features] (elementwise uniform, so equivalent).
    w_mu_t = jax.random.uniform(k_wmu, (in_features, out_features),
                                minval=-0.1, maxval=0.1).astype(param_dtype)
    w_rho_t = jax.random.uniform(k_wrho, (in_features, out_features),
                                 minval=-5.0, maxval=-4.0).astype(param_dtype)
    b_mu = jax.random.uniform(k_bmu, (out_features,),
                              minval=-0.1, maxval=0.1).astype(param_dtype)
    b_rho = jax.random.uniform(k_brho, (out_features,),
                               minval=-5.0, maxval=-4.0).astype(param_dtype)
    x = jax.random.normal(k_x, (batch, in_features), dtype=jnp.float32)

    # Standard-normal eps (the torch forward's Normal(0,1).sample(...)).
    w_eps = jax.random.normal(k_weps, (in_features, out_features)).astype(param_dtype)
    b_eps = jax.random.normal(k_beps, (out_features,)).astype(param_dtype)

    # Lean path (no sampled-weight writeback)...
    y, log_prior, log_post = jax.block_until_ready(
        linear_bbb_forward(x, w_mu_t, w_rho_t, b_mu, b_rho, w_eps, b_eps))

    # ...and the path that also returns self.w / self.b like the torch module does.
    y2, lp2, lq2, w_s, b_s = jax.block_until_ready(
        linear_bbb_forward(x, w_mu_t, w_rho_t, b_mu, b_rho, w_eps, b_eps,
                           return_samples=True))

    # Pure-JAX reference (identical bf16-stored params / eps, upcast to f32).
    f32 = jnp.float32
    w_ref = w_mu_t.astype(f32) + jnp.exp(w_rho_t.astype(f32)) * w_eps.astype(f32)
    b_ref = b_mu.astype(f32) + jnp.exp(b_rho.astype(f32)) * b_eps.astype(f32)
    y_ref = x @ w_ref + b_ref
    lp_ref = (jnp.sum(-LOG_SQRT_2PI - 0.5 * w_ref ** 2)
              + jnp.sum(-LOG_SQRT_2PI - 0.5 * b_ref ** 2))
    lq_ref = (jnp.sum(-w_rho_t.astype(f32) - LOG_SQRT_2PI - 0.5 * w_eps.astype(f32) ** 2)
              + jnp.sum(-b_rho.astype(f32) - LOG_SQRT_2PI - 0.5 * b_eps.astype(f32) ** 2))

    assert jnp.allclose(y, y_ref, atol=2e-3, rtol=2e-3), "y mismatch"
    assert jnp.allclose(y2, y_ref, atol=2e-3, rtol=2e-3), "y (samples path) mismatch"
    assert jnp.allclose(log_prior, lp_ref, atol=1e-1, rtol=1e-3), "log_prior mismatch"
    assert jnp.allclose(log_post, lq_ref, atol=1e-1, rtol=1e-3), "log_post mismatch"
    assert jnp.allclose(lp2, lp_ref, atol=1e-1, rtol=1e-3), "log_prior (samples path)"
    assert jnp.allclose(lq2, lq_ref, atol=1e-1, rtol=1e-3), "log_post (samples path)"
    assert jnp.allclose(w_s.astype(f32), w_ref, atol=1e-2), "sampled w mismatch"
    assert jnp.allclose(b_s.astype(f32), b_ref, atol=1e-2), "sampled b mismatch"

    print("KERNEL_OK")
</pallas_src>

<mosaic_0001>
module attributes {stable_mosaic.version = 11 : i64} {
  func.func @linear_bbb_kernel(%arg0: i32, %arg1: i32, %arg2: memref<8x32xf32, #tpu.memory_space<vmem>>, %arg3: memref<32x16xbf16, #tpu.memory_space<vmem>>, %arg4: memref<32x16xbf16, #tpu.memory_space<vmem>>, %arg5: memref<32x16xbf16, #tpu.memory_space<vmem>>, %arg6: memref<1x16xbf16, #tpu.memory_space<vmem>>, %arg7: memref<1x16xbf16, #tpu.memory_space<vmem>>, %arg8: memref<1x16xbf16, #tpu.memory_space<vmem>>, %arg9: memref<8x16xf32, #tpu.memory_space<vmem>>, %arg10: memref<1x16xf32, #tpu.memory_space<vmem>>, %arg11: memref<1x16xf32, #tpu.memory_space<vmem>>) attributes {dimension_semantics = [#tpu.dimension_semantics<parallel>, #tpu.dimension_semantics<arbitrary>], iteration_bounds = array<i64: 1, 1>, scalar_prefetch = 0 : i64, scratch_operands = 0 : i64, tpu.core_type = #tpu.core_type<tc>, window_params = [{transform_indices = @transform_0, window_bounds = array<i64: 8, 32>}, {transform_indices = @transform_1, window_bounds = array<i64: 32, 16>}, {transform_indices = @transform_2, window_bounds = array<i64: 32, 16>}, {transform_indices = @transform_3, window_bounds = array<i64: 32, 16>}, {transform_indices = @transform_4, window_bounds = array<i64: 1, 16>}, {transform_indices = @transform_5, window_bounds = array<i64: 1, 16>}, {transform_indices = @transform_6, window_bounds = array<i64: 1, 16>}, {transform_indices = @transform_7, window_bounds = array<i64: 8, 16>}, {transform_indices = @transform_8, window_bounds = array<i64: 1, 16>}, {transform_indices = @transform_9, window_bounds = array<i64: 1, 16>}]} {
    %c0 = arith.constant 0 : index
    %c0_0 = arith.constant 0 : index
    %0 = vector.load %arg3[%c0, %c0_0] : memref<32x16xbf16, #tpu.memory_space<vmem>>, vector<32x16xbf16>
    %1 = arith.extf %0 : vector<32x16xbf16> to vector<32x16xf32>
    %c0_1 = arith.constant 0 : index
    %c0_2 = arith.constant 0 : index
    %2 = vector.load %arg4[%c0_1, %c0_2] : memref<32x16xbf16, #tpu.memory_space<vmem>>, vector<32x16xbf16>
    %3 = arith.extf %2 : vector<32x16xbf16> to vector<32x16xf32>
    %c0_3 = arith.constant 0 : index
    %c0_4 = arith.constant 0 : index
    %4 = vector.load %arg5[%c0_3, %c0_4] : memref<32x16xbf16, #tpu.memory_space<vmem>>, vector<32x16xbf16>
    %5 = arith.extf %4 : vector<32x16xbf16> to vector<32x16xf32>
    %6 = math.exp %3 : vector<32x16xf32>
    %7 = arith.mulf %6, %5 : vector<32x16xf32>
    %8 = arith.addf %1, %7 : vector<32x16xf32>
    %9 = arith.mulf %8, %8 : vector<32x16xf32>
    %cst = arith.constant dense<0.000000e+00> : vector<16xf32>
    %10 = vector.multi_reduction <add>, %9, %cst [0] : vector<32x16xf32> to vector<16xf32>
    %11 = vector.shape_cast %10 : vector<16xf32> to vector<1x16xf32>
    %12 = arith.mulf %5, %5 : vector<32x16xf32>
    %cst_5 = arith.constant 5.000000e-01 : f32
    %13 = vector.broadcast %cst_5 : f32 to vector<32x16xf32>
    %14 = arith.mulf %13, %12 : vector<32x16xf32>
    %15 = arith.addf %3, %14 : vector<32x16xf32>
    %cst_6 = arith.constant dense<0.000000e+00> : vector<16xf32>
    %16 = vector.multi_reduction <add>, %15, %cst_6 [0] : vector<32x16xf32> to vector<16xf32>
    %17 = vector.shape_cast %16 : vector<16xf32> to vector<1x16xf32>
    %c0_7 = arith.constant 0 : index
    %c0_8 = arith.constant 0 : index
    %18 = vector.load %arg2[%c0_7, %c0_8] : memref<8x32xf32, #tpu.memory_space<vmem>>, vector<8x32xf32>
    %cst_9 = arith.constant dense<0.000000e+00> : vector<8x16xf32>
    %19 = tpu.matmul %18, %8, %cst_9 {dimension_numbers = #tpu.dot_dimension_numbers<[1], [0], [0], [1], [0, 0, 1, 1], [], []>} : vector<8x32xf32>, vector<32x16xf32>, vector<8x16xf32> -> vector<8x16xf32>
    %c0_i32 = arith.constant 0 : i32
    %20 = arith.cmpi eq, %arg1, %c0_i32 : i32
    %21 = arith.extui %20 : i1 to i32
    %c0_i32_10 = arith.constant 0 : i32
    %22 = arith.cmpi ne, %21, %c0_i32_10 : i32
    scf.if %22 {
      %c0_15 = arith.constant 0 : index
      %c0_16 = arith.constant 0 : index
      %29 = vector.load %arg9[%c0_15, %c0_16] : memref<8x16xf32, #tpu.memory_space<vmem>>, vector<8x16xf32>
      tpu.vector_store %arg9[%c0_15, %c0_16], %19 {strides = array<i32>} : memref<8x16xf32, #tpu.memory_space<vmem>>, vector<8x16xf32>,
      %c0_17 = arith.constant 0 : index
      %c0_18 = arith.constant 0 : index
      %30 = vector.load %arg10[%c0_17, %c0_18] : memref<1x16xf32, #tpu.memory_space<vmem>>, vector<1x16xf32>
      tpu.vector_store %arg10[%c0_17, %c0_18], %11 {strides = array<i32>} : memref<1x16xf32, #tpu.memory_space<vmem>>, vector<1x16xf32>,
      %c0_19 = arith.constant 0 : index
      %c0_20 = arith.constant 0 : index
      %31 = vector.load %arg11[%c0_19, %c0_20] : memref<1x16xf32, #tpu.memory_space<vmem>>, vector<1x16xf32>
      tpu.vector_store %arg11[%c0_19, %c0_20], %17 {strides = array<i32>} : memref<1x16xf32, #tpu.memory_space<vmem>>, vector<1x16xf32>,
    } else {
    }
    %c0_i32_11 = arith.constant 0 : i32
    %23 = arith.cmpi ne, %arg1, %c0_i32_11 : i32
    %24 = arith.extui %23 : i1 to i32
    %c0_i32_12 = arith.constant 0 : i32
    %25 = arith.cmpi ne, %24, %c0_i32_12 : i32
    scf.if %25 {
      %c0_15 = arith.constant 0 : index
      %c0_16 = arith.constant 0 : index
      %29 = vector.load %arg9[%c0_15, %c0_16] : memref<8x16xf32, #tpu.memory_space<vmem>>, vector<8x16xf32>
      %30 = arith.addf %29, %19 : vector<8x16xf32>
      %c0_17 = arith.constant 0 : index
      %c0_18 = arith.constant 0 : index
      %31 = vector.load %arg9[%c0_17, %c0_18] : memref<8x16xf32, #tpu.memory_space<vmem>>, vector<8x16xf32>
      tpu.vector_store %arg9[%c0_17, %c0_18], %30 {strides = array<i32>} : memref<8x16xf32, #tpu.memory_space<vmem>>, vector<8x16xf32>,
      %c0_19 = arith.constant 0 : index
      %c0_20 = arith.constant 0 : index
      %32 = vector.load %arg10[%c0_19, %c0_20] : memref<1x16xf32, #tpu.memory_space<vmem>>, vector<1x16xf32>
      %33 = arith.addf %32, %11 : vector<1x16xf32>
      %c0_21 = arith.constant 0 : index
      %c0_22 = arith.constant 0 : index
      %34 = vector.load %arg10[%c0_21, %c0_22] : memref<1x16xf32, #tpu.memory_space<vmem>>, vector<1x16xf32>
      tpu.vector_store %arg10[%c0_21, %c0_22], %33 {strides = array<i32>} : memref<1x16xf32, #tpu.memory_space<vmem>>, vector<1x16xf32>,
      %c0_23 = arith.constant 0 : index
      %c0_24 = arith.constant 0 : index
      %35 = vector.load %arg11[%c0_23, %c0_24] : memref<1x16xf32, #tpu.memory_space<vmem>>, vector<1x16xf32>
      %36 = arith.addf %35, %17 : vector<1x16xf32>
      %c0_25 = arith.constant 0 : index
      %c0_26 = arith.constant 0 : index
      %37 = vector.load %arg11[%c0_25, %c0_26] : memref<1x16xf32, #tpu.memory_space<vmem>>, vector<1x16xf32>
      tpu.vector_store %arg11[%c0_25, %c0_26], %36 {strides = array<i32>} : memref<1x16xf32, #tpu.memory_space<vmem>>, vector<1x16xf32>,
    } else {
    }
    %c0_i32_13 = arith.constant 0 : i32
    %26 = arith.cmpi eq, %arg1, %c0_i32_13 : i32
    %27 = arith.extui %26 : i1 to i32
    %c0_i32_14 = arith.constant 0 : i32
    %28 = arith.cmpi ne, %27, %c0_i32_14 : i32
    scf.if %28 {
      %c0_15 = arith.constant 0 : index
      %c0_16 = arith.constant 0 : index
      %29 = vector.load %arg6[%c0_15, %c0_16] : memref<1x16xbf16, #tpu.memory_space<vmem>>, vector<1x16xbf16>
      %30 = arith.extf %29 : vector<1x16xbf16> to vector<1x16xf32>
      %c0_17 = arith.constant 0 : index
      %c0_18 = arith.constant 0 : index
      %31 = vector.load %arg7[%c0_17, %c0_18] : memref<1x16xbf16, #tpu.memory_space<vmem>>, vector<1x16xbf16>
      %32 = arith.extf %31 : vector<1x16xbf16> to vector<1x16xf32>
      %c0_19 = arith.constant 0 : index
      %c0_20 = arith.constant 0 : index
      %33 = vector.load %arg8[%c0_19, %c0_20] : memref<1x16xbf16, #tpu.memory_space<vmem>>, vector<1x16xbf16>
      %34 = arith.extf %33 : vector<1x16xbf16> to vector<1x16xf32>
      %35 = math.exp %32 : vector<1x16xf32>
      %36 = arith.mulf %35, %34 : vector<1x16xf32>
      %37 = arith.addf %30, %36 : vector<1x16xf32>
      %c0_21 = arith.constant 0 : index
      %c0_22 = arith.constant 0 : index
      %38 = vector.load %arg9[%c0_21, %c0_22] : memref<8x16xf32, #tpu.memory_space<vmem>>, vector<8x16xf32>
      %39 = vector.broadcast %37 : vector<1x16xf32> to vector<8x16xf32>
      %40 = arith.addf %38, %39 : vector<8x16xf32>
      %c0_23 = arith.constant 0 : index
      %c0_24 = arith.constant 0 : index
      %41 = vector.load %arg9[%c0_23, %c0_24] : memref<8x16xf32, #tpu.memory_space<vmem>>, vector<8x16xf32>
      tpu.vector_store %arg9[%c0_23, %c0_24], %40 {strides = array<i32>} : memref<8x16xf32, #tpu.memory_space<vmem>>, vector<8x16xf32>,
      %c0_25 = arith.constant 0 : index
      %c0_26 = arith.constant 0 : index
      %42 = vector.load %arg10[%c0_25, %c0_26] : memref<1x16xf32, #tpu.memory_space<vmem>>, vector<1x16xf32>
      %43 = arith.mulf %37, %37 : vector<1x16xf32>
      %44 = arith.addf %42, %43 : vector<1x16xf32>
      %c0_27 = arith.constant 0 : index
      %c0_28 = arith.constant 0 : index
      %45 = vector.load %arg10[%c0_27, %c0_28] : memref<1x16xf32, #tpu.memory_space<vmem>>, vector<1x16xf32>
      tpu.vector_store %arg10[%c0_27, %c0_28], %44 {strides = array<i32>} : memref<1x16xf32, #tpu.memory_space<vmem>>, vector<1x16xf32>,
      %c0_29 = arith.constant 0 : index
      %c0_30 = arith.constant 0 : index
      %46 = vector.load %arg11[%c0_29, %c0_30] : memref<1x16xf32, #tpu.memory_space<vmem>>, vector<1x16xf32>
      %47 = arith.mulf %34, %34 : vector<1x16xf32>
      %cst_31 = arith.constant 5.000000e-01 : f32
      %48 = vector.broadcast %cst_31 : f32 to vector<1x16xf32>
      %49 = arith.mulf %48, %47 : vector<1x16xf32>
      %50 = arith.addf %32, %49 : vector<1x16xf32>
      %51 = arith.addf %46, %50 : vector<1x16xf32>
      %c0_32 = arith.constant 0 : index
      %c0_33 = arith.constant 0 : index
      %52 = vector.load %arg11[%c0_32, %c0_33] : memref<1x16xf32, #tpu.memory_space<vmem>>, vector<1x16xf32>
      tpu.vector_store %arg11[%c0_32, %c0_33], %51 {strides = array<i32>} : memref<1x16xf32, #tpu.memory_space<vmem>>, vector<1x16xf32>,
    } else {
    }
    return
  }
  func.func @transform_0(%arg0: i32, %arg1: i32) -> (i32, i32) {
    %c0_i32 = arith.constant 0 : i32
    %c0_i32_0 = arith.constant 0 : i32
    return %c0_i32, %arg1 : i32, i32
  }
  func.func @transform_1(%arg0: i32, %arg1: i32) -> (i32, i32) {
    %c0_i32 = arith.constant 0 : i32
    return %arg1, %arg0 : i32, i32
  }
  func.func @transform_2(%arg0: i32, %arg1: i32) -> (i32, i32) {
    %c0_i32 = arith.constant 0 : i32
    return %arg1, %arg0 : i32, i32
  }
  func.func @transform_3(%arg0: i32, %arg1: i32) -> (i32, i32) {
    %c0_i32 = arith.constant 0 : i32
    return %arg1, %arg0 : i32, i32
  }
  func.func @transform_4(%arg0: i32, %arg1: i32) -> (i32, i32) {
    %c0_i32 = arith.constant 0 : i32
    %c0_i32_0 = arith.constant 0 : i32
    return %c0_i32, %arg0 : i32, i32
  }
  func.func @transform_5(%arg0: i32, %arg1: i32) -> (i32, i32) {
    %c0_i32 = arith.constant 0 : i32
    %c0_i32_0 = arith.constant 0 : i32
    return %c0_i32, %arg0 : i32, i32
  }
  func.func @transform_6(%arg0: i32, %arg1: i32) -> (i32, i32) {
    %c0_i32 = arith.constant 0 : i32
    %c0_i32_0 = arith.constant 0 : i32
    return %c0_i32, %arg0 : i32, i32
  }
  func.func @transform_7(%arg0: i32, %arg1: i32) -> (i32, i32) {
    %c0_i32 = arith.constant 0 : i32
    %c0_i32_0 = arith.constant 0 : i32
    return %c0_i32, %arg0 : i32, i32
  }
  func.func @transform_8(%arg0: i32, %arg1: i32) -> (i32, i32) {
    %c0_i32 = arith.constant 0 : i32
    %c0_i32_0 = arith.constant 0 : i32
    return %c0_i32, %arg0 : i32, i32
  }
  func.func @transform_9(%arg0: i32, %arg1: i32) -> (i32, i32) {
    %c0_i32 = arith.constant 0 : i32
    %c0_i32_0 = arith.constant 0 : i32
    return %c0_i32, %arg0 : i32, i32
  }
}

</mosaic_0001>

<bundles_post_ra>
// kernel: linear_bbb_forward.1
= control target key start
LH: loop header
LB: loop body
LE: loop exit
PB: predicated region body
PF: predicated region fallthrough
CT: control target
= control target key end

     0   :  { %v342_v2 = vmov 0.0   ;;  %s465_s0 = inlined_call_operand.vmem [shape: f32[8,32], index: 0, kind: input, shape index: {}]   ;;  %s466_s1 = inlined_call_operand.vmem [shape: bf16[32,16], index: 1, kind: input, shape index: {}]   ;;  %s467_s2 = inlined_call_operand.vmem [shape: bf16[32,16], index: 2, kind: input, shape index: {}]   ;;  %s468_s3 = inlined_call_operand.vmem [shape: bf16[32,16], index: 3, kind: input, shape index: {}]   ;;  %s469_s4 = inlined_call_operand.vmem [shape: bf16[1,16], index: 4, kind: input, shape index: {}]   ;;  %s470_s5 = inlined_call_operand.vmem [shape: bf16[1,16], index: 5, kind: input, shape index: {}]   ;;  %s471_s6 = inlined_call_operand.vmem [shape: bf16[1,16], index: 6, kind: input, shape index: {}]   ;;  %s472_s7 = inlined_call_operand.hbm [shape: f32[8,16], index: 7, kind: output, shape index: {0}]   ;;  %s473_s8 = inlined_call_operand.vmem [shape: f32[1,16], index: 8, kind: output, shape index: {1}]   ;;  %s474_s9 = inlined_call_operand.vmem [shape: f32[1,16], index: 9, kind: output, shape index: {2}]  }
   0x1   :  { %v289_v0 = vld [vmem:[%s467_s2 + $0x8] sm:$0xff]   ;;  %296 = vmatprep.subr.mxu0 %v342_v2  ;;  %v273_v5 = vld [vmem:[%s467_s2] sm:$0xff]  }
   0x2   :  { %v290_v1 = vld [vmem:[%s468_s3 + $0x8] sm:$0xff]   ;;  %v278_v3 = vunpack.c.l.bf16 %v289_v0  ;;  %v279_v4 = vunpack.c.h.bf16 %v289_v0  ;;  %v281_v6 = vld [vmem:[%s468_s3] sm:$0xff]   ;;  %v275_v9 = vunpack.c.h.bf16 %v273_v5 }
   0x3   :  { %v286_v7 = vunpack.c.l.bf16 %v290_v1  ;;  %v287_v8 = vunpack.c.h.bf16 %v290_v1 }
   0x4   :  { %15 = vsyncpa [#allocation3], 0  ;;  %v58_v10 = vmul.f32 1.442695, %v278_v3  ;;  %v60_v11 = vmul.f32 1.442695, %v279_v4  ;;  %v283_v12 = vunpack.c.h.bf16 %v281_v6  ;;  %v274_v16 = vunpack.c.l.bf16 %v273_v5 }
   0x5   :  { %v90_v13 = vmul.f32 %v286_v7, %v286_v7  ;;  %v91_v14 = vmul.f32 %v287_v8, %v287_v8  ;;  %v56_v15 = vmul.f32 1.442695, %v275_v9  ;;  %v282_v18 = vunpack.c.l.bf16 %v281_v6  ;;  %v288_v33 = vld [vmem:[%s466_s1 + $0x8] sm:$0xff]   ;;  %v265_v35 = vld [vmem:[%s466_s1] sm:$0xff]   ;;  %s344_s13 = smov [#allocation2]  }
   0x6   :  { %310 = vpow2.f32 %v58_v10  ;;  %v89_v17 = vmul.f32 %v283_v12, %v283_v12  ;;  %v54_v20 = vmul.f32 1.442695, %v274_v16  ;;  %vm343_vm0 = vmmov 0   ;;  %s247_s14 = sshll.u32 %s344_s13, 4  ;;  %s248_s14 = int_to_ptr.vmem [resolvable:$true] %s247_s14 }
   0x7   :  { %312 = vpow2.f32 %v60_v11  ;;  %v94_v19 = vmul.f32 0.5, %v90_v13  ;;  %304 = vmatprep.mubr.msk.f32.mxu0 %vm343_vm0, %v342_v2  ;;  %v95_v21 = vmul.f32 0.5, %v91_v14  ;;  %v88_v23 = vmul.f32 %v282_v18, %v282_v18  ;;  %v215_v14 = vld [vmem:[%s470_s5] sm:$0x1]  ;;  %p325_p1 = scmp.lt.s32.totalorder %s248_s14, %s248_s14 }
   0x8   :  { %314 = vpow2.f32 %v56_v15  ;;  %v93_v22 = vmul.f32 0.5, %v89_v17  ;;  %vm74_vm1 = vcmask 130048   ;;  %v270_v38 = vunpack.c.l.bf16 %v288_v33  ;;  %v217_v17 = vld [vmem:[%s471_s6] sm:$0x1] }
   0x9   :  { %316 = vpow2.f32 %v54_v20  ;;  %v98_v24 = vadd.f32 %v278_v3, %v94_v19  ;;  %v92_v26 = vmul.f32 0.5, %v88_v23  ;;  %v99_v27 = vadd.f32 %v279_v4, %v95_v21  ;;  %v113_v3 = vld [vmem:[%s465_s0] sm:$0xff] }
   0xa   :  { %v97_v25 = vadd.f32 %v275_v9, %v93_v22  ;;  %v271_v39 = vunpack.c.h.bf16 %v288_v33  ;;  %v267_v43 = vunpack.c.h.bf16 %v265_v35  ;;  %v266_v46 = vunpack.c.l.bf16 %v265_v35  ;;  %v213_v20 = vld [vmem:[%s469_s4] sm:$0x1] }
   0xb   :  { %v96_v29 = vadd.f32 %v274_v16, %v92_v26  ;;  %v103_v30 = vsel %vm74_vm1, %v98_v24, 0.0  ;;  %v105_v34 = vsel %vm74_vm1, %v99_v27, 0.0  ;;  %vm114_vm2 = vcmask 261120  }
   0xc   :  { %v101_v28 = vsel %vm74_vm1, %v97_v25, 0.0  ;;  %vm193_vm3 = vcmask 122880   ;;  %v216_v15 = vunpack.c.l.bf16 %v215_v14  ;;  %v214_v21 = vunpack.c.l.bf16 %v213_v20 }
   0xd   :  { %v100_v31 = vsel %vm74_vm1, %v96_v29, 0.0 }
   0xe   :  { %v102_v32 = vadd.f32 %v101_v28, %v100_v31  ;;  %v219_v16 = vmul.f32 1.442695, %v216_v15 }
  0x10   :  { %v104_v36 = vadd.f32 %v103_v30, %v102_v32  ;;  %318 = vpow2.f32 %v219_v16  ;;  %v224_v32 = vlaneseq }
  0x12   :  { %v106_v40 = vadd.f32 %v105_v34, %v104_v36  ;;  %v225_v33 = vshrl.u32 %v224_v32, 7 }
  0x13   :  { %v311_v37 = vpop.eup %310 }
  0x14   :  { %v313_v41 = vpop.eup %312  ;;  %v64_v42 = vmul.f32 %v311_v37, %v286_v7  ;;  %v107_v47 = vrot.slane %v106_v40, 4  ;;  %v226_v35 = vsub.s32 0, %v225_v33 }
  0x15   :  { %v315_v44 = vpop.eup %314  ;;  %v65_v45 = vmul.f32 %v313_v41, %v287_v8 }
  0x16   :  { %v317_v48 = vpop.eup %316  ;;  %v63_v49 = vmul.f32 %v315_v44, %v283_v12  ;;  %v68_v51 = vadd.f32 %v270_v38, %v64_v42  ;;  %v108_v53 = vadd.f32 %v107_v47, %v106_v40 }
  0x17   :  { %v69_v50 = vadd.f32 %v271_v39, %v65_v45  ;;  %v62_v52 = vmul.f32 %v317_v48, %v282_v18  ;;  %v218_v18 = vunpack.c.l.bf16 %v217_v17 }
  0x18   :  { %v67_v54 = vadd.f32 %v267_v43, %v63_v49  ;;  %v72_v55 = vmul.f32 %v68_v51, %v68_v51  ;;  %v109_v57 = vrot.slane %v108_v53, 2 }
  0x19   :  { %297 = vmatpush3.msra.mxu0 %v69_v50  ;;  %v66_v56 = vadd.f32 %v266_v46, %v62_v52  ;;  %v73_v59 = vmul.f32 %v69_v50, %v69_v50  ;;  %v236_v23 = vmul.f32 %v218_v18, %v218_v18 }
  0x1a   :  { %298 = vmatprep.subr.mxu0 %v342_v2  ;;  %v71_v58 = vmul.f32 %v67_v54, %v67_v54  ;;  %v110_v61 = vadd.f32 %v109_v57, %v108_v53  ;;  %v78_v63 = vsel %vm74_vm1, %v72_v55, 0.0 }
  0x1b   :  { %299 = vmatpush3.msra.mxu0 %v68_v51  ;;  %v70_v60 = vmul.f32 %v66_v56, %v66_v56  ;;  %v80_v5 = vsel %vm74_vm1, %v73_v59, 0.0  ;;  %v237_v25 = vmul.f32 0.5, %v236_v23 }
  0x1c   :  { %300 = vmatprep.subr.mxu0 %v342_v2  ;;  %v76_v62 = vsel %vm74_vm1, %v71_v58, 0.0  ;;  %v111_v1 = vrot.slane %v110_v61, 1 }
  0x1d   :  { %301 = vmatpush3.msra.mxu0 %v67_v54  ;;  %v75_v0 = vsel %vm74_vm1, %v70_v60, 0.0  ;;  %v319_v19 = vpop.eup %318  ;;  %v238_v27 = vadd.f32 %v237_v25, %v216_v15 }
  0x1e   :  { %302 = vmatprep.subr.mxu0 %v342_v2  ;;  %v77_v4 = vadd.f32 %v76_v62, %v75_v0  ;;  %v112_v6 = vadd.f32 %v111_v1, %v110_v61  ;;  %v221_v22 = vmul.f32 %v319_v19, %v218_v18 }
  0x1f   :  { %303 = vmatpush3.msra.mxu0 %v66_v56 }
  0x20   :  { %v79_v7 = vadd.f32 %v78_v63, %v77_v4  ;;  %305 = vmatmul.mubr.msk.f32.vlgmr.msra.gmra.mxu0 %vm114_vm2, %v113_v3  ;;  %195 = vst.msk [vmem:[%s474_s9] sm:$0x1] %vm193_vm3, %v112_v6  ;;  %v222_v24 = vadd.f32 %v221_v22, %v214_v21 }
  0x22   :  { %v81_v8 = vadd.f32 %v80_v5, %v79_v7  ;;  %v231_v26 = vmul.f32 %v222_v24, %v222_v24  ;;  %v227_v37 = vrot.slane %v222_v24, %v226_v35 }
  0x24   :  { %v82_v9 = vrot.slane %v81_v8, 4 }
  0x26   :  { %v83_v10 = vadd.f32 %v82_v9, %v81_v8 }
  0x27   :  { %v235_v29 = vld [vmem:[%s474_s9] sm:$0x1] }
  0x28   :  { %v84_v11 = vrot.slane %v83_v10, 2  ;;  %v239_v31 = vadd.f32 %v238_v27, %v235_v29 }
  0x2a   :  { %v85_v12 = vadd.f32 %v84_v11, %v83_v10  ;;  %240 = vst.msk [vmem:[%s474_s9] sm:$0x1] %vm193_vm3, %v239_v31 }
  0x2c   :  { %v86_v13 = vrot.slane %v85_v12, 1 }
  0x2e   :  { %v87_v2 = vadd.f32 %v86_v13, %v85_v12 }
  0x30   :  { %194 = vst.msk [vmem:[%s473_s8] sm:$0x1] %vm193_vm3, %v87_v2 }
  0x37   :  { %v230_v28 = vld [vmem:[%s473_s8] sm:$0x1] }
  0x38   :  { %v232_v30 = vadd.f32 %v231_v26, %v230_v28 }
  0x3a   :  { %234 = vst.msk [vmem:[%s473_s8] sm:$0x1] %vm193_vm3, %v232_v30  ;;  %s320_s8 = scalar_lea.vmem %s248_s14, 128 }
  0x3b   :  { %p321_p0 = scmp.ne.s32.totalorder %s248_s14, %s320_s8  ;;  %p326_p2 = scmp.lt.s32.totalorder %s320_s8, %s320_s8 }
  0x3d   :  { %p327_p3 = por %p326_p2, %p325_p1 }
  0x3f   :  { %p328_p4 = pnand %p327_p3, %p321_p0 }
  0xe0   :  { %v184_v34 = vpop.f32.mrf.mxu0 }
  0xe1   :  { %192 = vst.msk [vmem:[#allocation2] sm:$0xff] %vm74_vm1, %v184_v34 }
  0xe2   :  { %v306_v36 = vpop.f32.mrf.mxu0 }
  0xe8   :  { %v223_v38 = vld [vmem:[#allocation2] sm:$0xff] }
  0xe9   :  { %v228_v39 = vadd.f32 %v227_v37, %v223_v38 }
  0xeb   :  { %229 = vst.msk [vmem:[#allocation2] sm:$0xff] %vm74_vm1, %v228_v39 }
  0xec   :  { %331 = shalt.err (!%p328_p4)
}
  0xed   :  { %250 = dma.vmem_to_hbm [thread:$0]  %s248_s14, 128, %s472_s7, [#allocation3]  }
  0xee   :  { %340 = dma.done.wait [#allocation3], 128  }
  0xef   :  { %341 = vsyncadd [#allocation3], 4294967168 }
  0xf0   :  { %262 = vsyncpa [#allocation3], 1 }

</bundles_post_ra>
